<compile_context>
chip_gen: v7x
topology: tpu7x:2x2x1
jax: 0.10.0
libtpu: 0.0.40
codegen_flags: <defaults>
</compile_context>

<pallas_src>
import functools

import jax
import jax.numpy as jnp
from jax.experimental import pallas as pl
from jax.experimental.pallas import tpu as pltpu


_N_DMA_SLOTS = 4          # max HBM->HBM DMAs kept in flight
_MAX_CHUNKS = 128         # cap on the unrolled DMA-issue loop (bounds trace size)
_LANE_CANDIDATES = (8192, 4096, 2048, 1024, 512, 256, 128)  # largest first


def _default_chunk_bytes() -> int:
    """Generation-aware DMA chunk size (the HBM->HBM copy uses no VMEM)."""
    try:
        vmem = int(pltpu.get_tpu_info().vmem_capacity_bytes)
    except Exception:  # off-TPU tracing / API drift: safe default
        vmem = 128 << 20
    # v7x-class parts (<=64 MiB VMEM per TC) have ~2.3x faster HBM: keep chunks
    # a bit smaller so more DMAs stay in flight; v5e/v6e take 16 MiB chunks.
    return (8 << 20) if vmem <= (64 << 20) else (16 << 20)


def _plan_view(shape) -> tuple:
    """Pick a contiguous 2-D (rows, cols) view of the flattened array."""
    n = 1
    for s in shape:
        n *= int(s)
    for cols in _LANE_CANDIDATES:
        if n % cols == 0:
            return n // cols, cols
    if len(shape) >= 2:
        cols = int(shape[-1])
        return n // cols, cols
    return 1, n


def _plan_chunks(rows, cols, itemsize, chunk_bytes):
    """Static (start, size) row-chunks of ~chunk_bytes each."""
    row_bytes = max(1, cols * itemsize)
    chunk_rows = max(1, int(chunk_bytes) // row_bytes)
    n_chunks = -(-rows // chunk_rows)
    if n_chunks > _MAX_CHUNKS:  # keep the unrolled issue loop bounded
        chunk_rows = -(-rows // _MAX_CHUNKS)
    chunks = []
    start = 0
    while start < rows:
        size = min(chunk_rows, rows - start)
        chunks.append((start, size))
        start += size
    return chunks


# ----------------------------------------------------------------------------
# Kernel: chunked HBM -> HBM identity copy (no VMEM bounce).
# ----------------------------------------------------------------------------
def _dma_copy_kernel(chunks, x_hbm, o_hbm, sems):
    n_slots = min(len(chunks), _N_DMA_SLOTS)
    inflight = []
    for idx, (start, size) in enumerate(chunks):
        slot = idx % n_slots
        if idx >= n_slots:
            # Free this semaphore slot: wait on the copy issued n_slots ago.
            inflight[idx - n_slots].wait()
        cp = pltpu.make_async_copy(
            x_hbm.at[start:start + size, :],
            o_hbm.at[start:start + size, :],
            sems.at[slot],
        )
        cp.start()
        inflight.append(cp)
    # Drain the remaining outstanding DMAs.
    for cp in inflight[len(chunks) - n_slots:]:
        cp.wait()


def _pallas_hbm_copy(x2d, chunks):
    rows, cols = x2d.shape
    itemsize = jnp.dtype(x2d.dtype).itemsize
    return pl.pallas_call(
        functools.partial(_dma_copy_kernel, chunks),
        out_shape=jax.ShapeDtypeStruct((rows, cols), x2d.dtype),
        in_specs=[pl.BlockSpec(memory_space=pl.ANY)],
        out_specs=pl.BlockSpec(memory_space=pl.ANY),
        scratch_shapes=[pltpu.SemaphoreType.DMA((_N_DMA_SLOTS,))],
        cost_estimate=pl.CostEstimate(
            flops=0,
            transcendentals=0,
            bytes_accessed=2 * rows * cols * itemsize,
        ),
    )(x2d)


def _materialize_impl(zt, chunk_bytes=None):
    if zt.size == 0:
        return zt
    if chunk_bytes is None:
        chunk_bytes = _default_chunk_bytes()
    rows, cols = _plan_view(zt.shape)
    itemsize = jnp.dtype(zt.dtype).itemsize
    chunks = _plan_chunks(rows, cols, itemsize, chunk_bytes)
    out2d = _pallas_hbm_copy(zt.reshape(rows, cols), chunks)
    return out2d.reshape(zt.shape)


# pallas_call has no automatic VJP; the backward of an identity copy is identity.
@jax.custom_vjp
def _materialize(zt):
    return _materialize_impl(zt)


def _materialize_fwd(zt):
    return _materialize_impl(zt), None


def _materialize_bwd(_, g):
    return (g,)


_materialize.defvjp(_materialize_fwd, _materialize_bwd)


# ----------------------------------------------------------------------------
# Public API
# ----------------------------------------------------------------------------
def geocurve_forward(zt: jax.Array, *, materialize: bool = False) -> jax.Array:
    """GeoCurve.forward(): returns the curve parameter `zt`.

    materialize=False (default): zero-cost, returns `zt` itself (matches the
    PyTorch module, which returns the Parameter tensor).
    materialize=True: produce a fresh HBM buffer via a chunked HBM->HBM DMA
    Pallas copy (differentiable through a custom identity VJP).
    """
    if not materialize:
        return zt
    return _materialize(zt)


class GeoCurve:
    """JAX analogue of the PyTorch GeoCurve module (forward = return zt)."""

    def __init__(self, zt: jax.Array) -> None:
        self.zt = zt  # the "parameter"

    def __call__(self, *, materialize: bool = False) -> jax.Array:
        return geocurve_forward(self.zt, materialize=materialize)


if __name__ == "__main__":
    key = jax.random.PRNGKey(0)
    k1, k2, k3 = jax.random.split(key, 3)

    # Case 1: lane-friendly small curve (T=64 time-steps, D=256 latent dim).
    zt1 = jax.random.normal(k1, (64, 256), dtype=jnp.float32)
    model = GeoCurve(zt1)

    # Fast path: forward returns the parameter itself (no kernel launched).
    fast = model()
    assert fast is zt1

    # Materialized path: single HBM->HBM DMA (fits in one chunk).
    out1 = jax.block_until_ready(model(materialize=True))
    assert out1.shape == zt1.shape and out1.dtype == zt1.dtype
    assert bool(jnp.all(out1 == zt1))

    # Case 2: many-chunk coverage — tiny chunk target so >4 chunks are issued
    # and the sliding-window semaphore reuse path is exercised.
    zt3 = jax.random.normal(k3, (40, 128), dtype=jnp.float32)
    out3 = jax.block_until_ready(_materialize_impl(zt3, chunk_bytes=1024))
    assert bool(jnp.all(out3 == zt3))

    # Case 3: ragged shape (total size not a multiple of 128) -> natural-fold
    # view; a direct HBM->HBM DMA handles it with no VMEM/tiling constraints.
    zt2 = jax.random.normal(k2, (10, 96), dtype=jnp.float32)
    out2 = jax.block_until_ready(geocurve_forward(zt2, materialize=True))
    assert bool(jnp.all(out2 == zt2))

    # Gradients flow through the materialized path (identity backward).
    g = jax.grad(lambda z: jnp.sum(geocurve_forward(z, materialize=True)))(zt1)
    g = jax.block_until_ready(g)
    assert bool(jnp.all(g == jnp.ones_like(zt1)))

    print("KERNEL_OK")
</pallas_src>

<mosaic_0001>
module attributes {stable_mosaic.version = 11 : i64} {
  func.func @_dma_copy_kernel(%arg0: memref<2x8192xf32, #tpu.memory_space<any>>, %arg1: memref<2x8192xf32, #tpu.memory_space<any>>, %arg2: memref<4x!tpu.dma_semaphore, #tpu.memory_space<semaphore_mem>>) attributes {dimension_semantics = [], scalar_prefetch = 0 : i64, scratch_operands = 1 : i64, tpu.core_type = #tpu.core_type<tc>} {
    %c0_i32 = arith.constant 0 : i32
    %c0_i32_0 = arith.constant 0 : i32
    %c0_i32_1 = arith.constant 0 : i32
    %0 = tpu.memref_slice %arg0[%c0_i32_0, %c0_i32_1] : memref<2x8192xf32, #tpu.memory_space<any>> -> memref<2x8192xf32, #tpu.memory_space<any>>
    %c0_i32_2 = arith.constant 0 : i32
    %c0_i32_3 = arith.constant 0 : i32
    %1 = tpu.memref_slice %arg1[%c0_i32_2, %c0_i32_3] : memref<2x8192xf32, #tpu.memory_space<any>> -> memref<2x8192xf32, #tpu.memory_space<any>>
    %2 = tpu.memref_slice %arg2[%c0_i32] : memref<4x!tpu.dma_semaphore, #tpu.memory_space<semaphore_mem>> -> memref<1x!tpu.dma_semaphore, #tpu.memory_space<semaphore_mem>>
    %3 = tpu.memref_squeeze %2 : memref<1x!tpu.dma_semaphore, #tpu.memory_space<semaphore_mem>> -> memref<!tpu.dma_semaphore, #tpu.memory_space<semaphore_mem>>
    tpu.enqueue_dma source(%0 : memref<2x8192xf32, #tpu.memory_space<any>>) target(%1 : memref<2x8192xf32, #tpu.memory_space<any>>) target_semaphore(%3 : memref<!tpu.dma_semaphore, #tpu.memory_space<semaphore_mem>>)
    %c0_i32_4 = arith.constant 0 : i32
    %c0_i32_5 = arith.constant 0 : i32
    %c0_i32_6 = arith.constant 0 : i32
    %4 = tpu.memref_slice %arg0[%c0_i32_5, %c0_i32_6] : memref<2x8192xf32, #tpu.memory_space<any>> -> memref<2x8192xf32, #tpu.memory_space<any>>
    %c0_i32_7 = arith.constant 0 : i32
    %c0_i32_8 = arith.constant 0 : i32
    %5 = tpu.memref_slice %arg1[%c0_i32_7, %c0_i32_8] : memref<2x8192xf32, #tpu.memory_space<any>> -> memref<2x8192xf32, #tpu.memory_space<any>>
    %6 = tpu.memref_slice %arg2[%c0_i32_4] : memref<4x!tpu.dma_semaphore, #tpu.memory_space<semaphore_mem>> -> memref<1x!tpu.dma_semaphore, #tpu.memory_space<semaphore_mem>>
    %7 = tpu.memref_squeeze %6 : memref<1x!tpu.dma_semaphore, #tpu.memory_space<semaphore_mem>> -> memref<!tpu.dma_semaphore, #tpu.memory_space<semaphore_mem>>
    tpu.wait_dma2 semaphore(%7 : memref<!tpu.dma_semaphore, #tpu.memory_space<semaphore_mem>>) src(%4 : memref<2x8192xf32, #tpu.memory_space<any>>) dst(%5 : memref<2x8192xf32, #tpu.memory_space<any>>)
    return
  }
}

</mosaic_0001>

<bundles_post_ra>
// kernel: tpu_custom_call.1
= control target key start
LH: loop header
LB: loop body
LE: loop exit
PB: predicated region body
PF: predicated region fallthrough
CT: control target
= control target key end

     0   :  { %s59_s6 = smov [#allocation2]   ;;  %s60_s7 = smov [#allocation3]   ;;  %s78_s0 = inlined_call_operand.hbm [shape: f32[2,8192], index: 0, kind: input, shape index: {}]   ;;  %s79_s1 = inlined_call_operand.hbm [shape: f32[2,8192], index: 1, kind: output, shape index: {}]  }
   0x1   :  { %s61_s8 = smov 0  }
   0x2   :  { %18 = dma.general %s78_s0, 2048, %s79_s1, %s59_s6, %s60_s7, [#allocation4], %s61_s8, 0  }
   0x3   :  { %57 = dma.done.wait [#allocation2], 2048 }
   0x4   :  { %58 = vsyncadd [#allocation2], 4294965248 }
   0x5   :  { %23 = vsyncmov [#allocation2] }
   0x8   :  { %s24_s13 = vpop.sfrf %23 }
   0x9   :  { %p50_p0 = scmp.ne.s32.totalorder %s24_s13, 0 }
   0xb   :  { %28 = shalt.err (%p50_p0)  }
   0xc   :  { %30 = vsyncmov [#allocation2 + $0x1] }
   0xf   :  { %s31_s14 = vpop.sfrf %30 }
  0x10   :  { %p51_p1 = scmp.ne.s32.totalorder %s31_s14, 0 }
  0x12   :  { %35 = shalt.err (%p51_p1)  }
  0x13   :  { %37 = vsyncmov [#allocation2 + $0x2] }
  0x16   :  { %s38_s15 = vpop.sfrf %37 }
  0x17   :  { %p52_p2 = scmp.ne.s32.totalorder %s38_s15, 0 }
  0x19   :  { %42 = shalt.err (%p52_p2)  }
  0x1a   :  { %44 = vsyncmov [#allocation2 + $0x3] }
  0x1d   :  { %s45_s16 = vpop.sfrf %44 }
  0x1e   :  { %p53_p3 = scmp.ne.s32.totalorder %s45_s16, 0 }
  0x20   :  { %49 = shalt.err (%p53_p3)  }

</bundles_post_ra>
